<compile_context>
chip_gen: v7x
topology: tpu7x:2x2x1
jax: 0.10.0
libtpu: 0.0.40
codegen_flags: <defaults>
</compile_context>

<pallas_src>
import jax
import jax.numpy as jnp
from jax.experimental import pallas as pl
from jax.experimental.pallas import tpu as pltpu


def fcnn_kernel(x_ref,
                w1_ref, b1_ref,
                w2_ref, b2_ref,
                w3_ref, b3_ref,
                w4_ref, b4_ref,
                o_ref):
    # x streams in as f32 and is cast to bf16 in VMEM (no separate XLA convert
    # pass over HBM in the wrapper).
    x = x_ref[...].astype(jnp.bfloat16)

    # Layer 1: (TB, D) @ (D, 64) -> f32 accumulate; bias + ReLU in f32.
    h = jnp.dot(x, w1_ref[...], preferred_element_type=jnp.float32)
    h = jnp.maximum(h + b1_ref[...], 0.0)

    # Layer 2: (TB, 64) @ (64, 40)
    h = jnp.dot(h.astype(jnp.bfloat16), w2_ref[...],
                preferred_element_type=jnp.float32)
    h = jnp.maximum(h + b2_ref[...], 0.0)

    # Layer 3: (TB, 40) @ (40, 32)
    h = jnp.dot(h.astype(jnp.bfloat16), w3_ref[...],
                preferred_element_type=jnp.float32)
    h = jnp.maximum(h + b3_ref[...], 0.0)

    # Layer 4 (dout == 1): contract the 32 features against w4 stored as a
    # (1, 32) row -> result is (1, TB) directly, i.e. already lane-dense for
    # the output store (no (TB,1) column write, no relayout).
    logits = jax.lax.dot_general(
        w4_ref[...], h.astype(jnp.bfloat16),
        dimension_numbers=(((1,), (1,)), ((), ())),
        preferred_element_type=jnp.float32)            # (1, TB)
    o_ref[...] = jax.nn.sigmoid(logits + b4_ref[...]).astype(o_ref.dtype)


def _round_up(n, m):
    return ((n + m - 1) // m) * m


def _pick_batch_tile(B, D):
    """Largest batch tile that fits comfortably in scoped VMEM on all gens."""
    # Per batch-row VMEM bytes: double-buffered f32 x row + three lane-padded
    # f32 intermediates (64/40/32 features each pad to 128 lanes).
    per_row = 2 * D * 4 + 3 * 128 * 4
    budget = 12 * 1024 * 1024   # below v5e's 16 MiB scoped default; fine on v6e/v7x
    cap = max(256, min(2048, (budget // per_row) // 256 * 256))
    if B <= cap:
        return B                # single full-array block (exact shapes, grid = 1)
    # Multiple of 256 (full MXU M-passes, 128-lane-aligned output blocks) and
    # at least 2 tiles so the "parallel" axis can shard across v7x's two TCs.
    return min(cap, _round_up(-(-B // 2), 256))


def fcnn_forward(x, kparams):
    """x: (B, D) float32; kparams: output of prepare_params()."""
    B, D = x.shape
    TB = _pick_batch_tile(B, D)
    num_tiles = -(-B // TB)          # last tile may be partial; rows independent
    out_len = num_tiles * TB

    w1, b1 = kparams["w1"], kparams["b1"]
    w2, b2 = kparams["w2"], kparams["b2"]
    w3, b3 = kparams["w3"], kparams["b3"]
    w4, b4 = kparams["w4"], kparams["b4"]

    def resident(arr):
        # Full-array block, same block every grid step -> fetched once and
        # stays VMEM-resident across the whole grid.
        return pl.BlockSpec(arr.shape, lambda i: (0, 0))

    hidden_flops = D * 64 + 64 * 40 + 40 * 32 + 32 * 1
    cost = pl.CostEstimate(
        flops=2 * B * hidden_flops,
        transcendentals=B,
        bytes_accessed=(B * D * 4 + out_len * 4
                        + 2 * (D * 64 + 64 * 40 + 40 * 32 + 32)
                        + 4 * (64 + 40 + 32 + 1)))

    out = pl.pallas_call(
        fcnn_kernel,
        out_shape=jax.ShapeDtypeStruct((1, out_len), jnp.float32),
        grid=(num_tiles,),
        in_specs=[
            pl.BlockSpec((TB, D), lambda i: (i, 0)),   # streamed f32 batch tile
            resident(w1), resident(b1),
            resident(w2), resident(b2),
            resident(w3), resident(b3),
            resident(w4), resident(b4),
        ],
        out_specs=pl.BlockSpec((1, TB), lambda i: (0, i)),
        compiler_params=pltpu.CompilerParams(
            dimension_semantics=("parallel",)),
        cost_estimate=cost,
    )(x, w1, b1, w2, b2, w3, b3, w4, b4)

    return out[0, :B].reshape(B, 1)


def prepare_params(params):
    """One-time conversion to kernel layouts/dtypes (call once, reuse)."""
    return {
        "w1": params["w1"].astype(jnp.bfloat16),
        "w2": params["w2"].astype(jnp.bfloat16),
        "w3": params["w3"].astype(jnp.bfloat16),
        "w4": params["w4"].reshape(1, 32).astype(jnp.bfloat16),  # (1, 32) row
        "b1": params["b1"],
        "b2": params["b2"],
        "b3": params["b3"],
        "b4": params["b4"].reshape(1, 1),
    }


def init_params(input_dim, key):
    """Deterministic init matching nn.Linear shapes (stored transposed)."""
    dims = [(input_dim, 64), (64, 40), (40, 32), (32, 1)]
    params = {}
    for i, (din, dout) in enumerate(dims, start=1):
        key, kw, kb = jax.random.split(key, 3)
        bound = 1.0 / jnp.sqrt(jnp.float32(din))  # PyTorch default uniform bound
        # PyTorch Linear weight is (dout, din); we store the transpose (din, dout).
        params[f"w{i}"] = jax.random.uniform(
            kw, (din, dout), jnp.float32, -bound, bound)
        params[f"b{i}"] = jax.random.uniform(
            kb, (1, dout), jnp.float32, -bound, bound)
    return params


if __name__ == "__main__":
    key = jax.random.PRNGKey(0)
    key, kx = jax.random.split(key)

    batch, input_dim = 8, 16
    x = jax.random.normal(kx, (batch, input_dim), jnp.float32)
    params = init_params(input_dim, key)
    kparams = prepare_params(params)   # one-time bf16 cast / re-layout

    out = jax.block_until_ready(fcnn_forward(x, kparams))

    # Pure-JAX f32 reference of the same math (kernel feeds bf16 into the MXU,
    # so compare with a loosened tolerance).
    h = x
    for i in range(1, 4):
        h = jnp.maximum(h @ params[f"w{i}"] + params[f"b{i}"], 0.0)
    ref = jax.nn.sigmoid(h @ params["w4"] + params["b4"])
    assert out.shape == (batch, 1)
    assert jnp.allclose(out, ref, atol=2e-2, rtol=2e-2)

    print("KERNEL_OK")
</pallas_src>

<mosaic_0001>
module attributes {stable_mosaic.version = 11 : i64} {
  func.func @fcnn_kernel(%arg0: i32, %arg1: memref<8x16xf32, #tpu.memory_space<vmem>>, %arg2: memref<16x64xbf16, #tpu.memory_space<vmem>>, %arg3: memref<1x64xf32, #tpu.memory_space<vmem>>, %arg4: memref<64x40xbf16, #tpu.memory_space<vmem>>, %arg5: memref<1x40xf32, #tpu.memory_space<vmem>>, %arg6: memref<40x32xbf16, #tpu.memory_space<vmem>>, %arg7: memref<1x32xf32, #tpu.memory_space<vmem>>, %arg8: memref<1x32xbf16, #tpu.memory_space<vmem>>, %arg9: memref<1x1xf32, #tpu.memory_space<vmem>>, %arg10: memref<1x8xf32, #tpu.memory_space<vmem>>) attributes {dimension_semantics = [#tpu.dimension_semantics<parallel>], iteration_bounds = array<i64: 1>, scalar_prefetch = 0 : i64, scratch_operands = 0 : i64, tpu.core_type = #tpu.core_type<tc>, window_params = [{transform_indices = @transform_0, window_bounds = array<i64: 8, 16>}, {pipeline_mode = #tpu.pipeline_mode<synchronous>, transform_indices = @transform_1, window_bounds = array<i64: 16, 64>}, {pipeline_mode = #tpu.pipeline_mode<synchronous>, transform_indices = @transform_2, window_bounds = array<i64: 1, 64>}, {pipeline_mode = #tpu.pipeline_mode<synchronous>, transform_indices = @transform_3, window_bounds = array<i64: 64, 40>}, {pipeline_mode = #tpu.pipeline_mode<synchronous>, transform_indices = @transform_4, window_bounds = array<i64: 1, 40>}, {pipeline_mode = #tpu.pipeline_mode<synchronous>, transform_indices = @transform_5, window_bounds = array<i64: 40, 32>}, {pipeline_mode = #tpu.pipeline_mode<synchronous>, transform_indices = @transform_6, window_bounds = array<i64: 1, 32>}, {pipeline_mode = #tpu.pipeline_mode<synchronous>, transform_indices = @transform_7, window_bounds = array<i64: 1, 32>}, {pipeline_mode = #tpu.pipeline_mode<synchronous>, transform_indices = @transform_8, window_bounds = array<i64: 1, 1>}, {transform_indices = @transform_9, window_bounds = array<i64: 1, 8>}]} {
    %c0 = arith.constant 0 : index
    %c0_0 = arith.constant 0 : index
    %0 = vector.load %arg1[%c0, %c0_0] : memref<8x16xf32, #tpu.memory_space<vmem>>, vector<8x16xf32>
    %1 = arith.truncf %0 : vector<8x16xf32> to vector<8x16xbf16>
    %c0_1 = arith.constant 0 : index
    %c0_2 = arith.constant 0 : index
    %2 = vector.load %arg2[%c0_1, %c0_2] : memref<16x64xbf16, #tpu.memory_space<vmem>>, vector<16x64xbf16>
    %cst = arith.constant dense<0.000000e+00> : vector<8x64xf32>
    %3 = tpu.matmul %1, %2, %cst {dimension_numbers = #tpu.dot_dimension_numbers<[1], [0], [0], [1], [0, 0, 1, 1], [], []>} : vector<8x16xbf16>, vector<16x64xbf16>, vector<8x64xf32> -> vector<8x64xf32>
    %c0_3 = arith.constant 0 : index
    %c0_4 = arith.constant 0 : index
    %4 = vector.load %arg3[%c0_3, %c0_4] : memref<1x64xf32, #tpu.memory_space<vmem>>, vector<1x64xf32>
    %5 = vector.broadcast %4 : vector<1x64xf32> to vector<8x64xf32>
    %6 = arith.addf %3, %5 : vector<8x64xf32>
    %cst_5 = arith.constant 0.000000e+00 : f32
    %7 = vector.broadcast %cst_5 : f32 to vector<8x64xf32>
    %8 = arith.maximumf %6, %7 : vector<8x64xf32>
    %9 = arith.truncf %8 : vector<8x64xf32> to vector<8x64xbf16>
    %c0_6 = arith.constant 0 : index
    %c0_7 = arith.constant 0 : index
    %10 = vector.load %arg4[%c0_6, %c0_7] : memref<64x40xbf16, #tpu.memory_space<vmem>>, vector<64x40xbf16>
    %cst_8 = arith.constant dense<0.000000e+00> : vector<8x40xf32>
    %11 = tpu.matmul %9, %10, %cst_8 {dimension_numbers = #tpu.dot_dimension_numbers<[1], [0], [0], [1], [0, 0, 1, 1], [], []>} : vector<8x64xbf16>, vector<64x40xbf16>, vector<8x40xf32> -> vector<8x40xf32>
    %c0_9 = arith.constant 0 : index
    %c0_10 = arith.constant 0 : index
    %12 = vector.load %arg5[%c0_9, %c0_10] : memref<1x40xf32, #tpu.memory_space<vmem>>, vector<1x40xf32>
    %13 = vector.broadcast %12 : vector<1x40xf32> to vector<8x40xf32>
    %14 = arith.addf %11, %13 : vector<8x40xf32>
    %cst_11 = arith.constant 0.000000e+00 : f32
    %15 = vector.broadcast %cst_11 : f32 to vector<8x40xf32>
    %16 = arith.maximumf %14, %15 : vector<8x40xf32>
    %17 = arith.truncf %16 : vector<8x40xf32> to vector<8x40xbf16>
    %c0_12 = arith.constant 0 : index
    %c0_13 = arith.constant 0 : index
    %18 = vector.load %arg6[%c0_12, %c0_13] : memref<40x32xbf16, #tpu.memory_space<vmem>>, vector<40x32xbf16>
    %cst_14 = arith.constant dense<0.000000e+00> : vector<8x32xf32>
    %19 = tpu.matmul %17, %18, %cst_14 {dimension_numbers = #tpu.dot_dimension_numbers<[1], [0], [0], [1], [0, 0, 1, 1], [], []>} : vector<8x40xbf16>, vector<40x32xbf16>, vector<8x32xf32> -> vector<8x32xf32>
    %c0_15 = arith.constant 0 : index
    %c0_16 = arith.constant 0 : index
    %20 = vector.load %arg7[%c0_15, %c0_16] : memref<1x32xf32, #tpu.memory_space<vmem>>, vector<1x32xf32>
    %21 = vector.broadcast %20 : vector<1x32xf32> to vector<8x32xf32>
    %22 = arith.addf %19, %21 : vector<8x32xf32>
    %cst_17 = arith.constant 0.000000e+00 : f32
    %23 = vector.broadcast %cst_17 : f32 to vector<8x32xf32>
    %24 = arith.maximumf %22, %23 : vector<8x32xf32>
    %c0_18 = arith.constant 0 : index
    %c0_19 = arith.constant 0 : index
    %25 = vector.load %arg8[%c0_18, %c0_19] : memref<1x32xbf16, #tpu.memory_space<vmem>>, vector<1x32xbf16>
    %26 = arith.truncf %24 : vector<8x32xf32> to vector<8x32xbf16>
    %cst_20 = arith.constant dense<0.000000e+00> : vector<1x8xf32>
    %27 = tpu.matmul %25, %26, %cst_20 {dimension_numbers = #tpu.dot_dimension_numbers<[1], [1], [0], [0], [0, 0, 1, 0], [], []>} : vector<1x32xbf16>, vector<8x32xbf16>, vector<1x8xf32> -> vector<1x8xf32>
    %c0_21 = arith.constant 0 : index
    %c0_22 = arith.constant 0 : index
    %28 = vector.load %arg9[%c0_21, %c0_22] : memref<1x1xf32, #tpu.memory_space<vmem>>, vector<1x1xf32>
    %29 = vector.broadcast %28 : vector<1x1xf32> to vector<1x8xf32>
    %30 = arith.addf %27, %29 : vector<1x8xf32>
    %31 = arith.negf %30 : vector<1x8xf32>
    %32 = math.exp %31 : vector<1x8xf32>
    %cst_23 = arith.constant 1.000000e+00 : f32
    %33 = vector.broadcast %cst_23 : f32 to vector<1x8xf32>
    %34 = arith.addf %33, %32 : vector<1x8xf32>
    %35 = arith.divf %33, %34 : vector<1x8xf32>
    %c0_24 = arith.constant 0 : index
    %c0_25 = arith.constant 0 : index
    %36 = vector.load %arg10[%c0_24, %c0_25] : memref<1x8xf32, #tpu.memory_space<vmem>>, vector<1x8xf32>
    tpu.vector_store %arg10[%c0_24, %c0_25], %35 {strides = array<i32>} : memref<1x8xf32, #tpu.memory_space<vmem>>, vector<1x8xf32>,
    return
  }
  func.func @transform_0(%arg0: i32) -> (i32, i32) {
    %c0_i32 = arith.constant 0 : i32
    %c0_i32_0 = arith.constant 0 : i32
    return %arg0, %c0_i32 : i32, i32
  }
  func.func @transform_1(%arg0: i32) -> (i32, i32) {
    %c0_i32 = arith.constant 0 : i32
    %c0_i32_0 = arith.constant 0 : i32
    %c0_i32_1 = arith.constant 0 : i32
    return %c0_i32, %c0_i32_0 : i32, i32
  }
  func.func @transform_2(%arg0: i32) -> (i32, i32) {
    %c0_i32 = arith.constant 0 : i32
    %c0_i32_0 = arith.constant 0 : i32
    %c0_i32_1 = arith.constant 0 : i32
    return %c0_i32, %c0_i32_0 : i32, i32
  }
  func.func @transform_3(%arg0: i32) -> (i32, i32) {
    %c0_i32 = arith.constant 0 : i32
    %c0_i32_0 = arith.constant 0 : i32
    %c0_i32_1 = arith.constant 0 : i32
    return %c0_i32, %c0_i32_0 : i32, i32
  }
  func.func @transform_4(%arg0: i32) -> (i32, i32) {
    %c0_i32 = arith.constant 0 : i32
    %c0_i32_0 = arith.constant 0 : i32
    %c0_i32_1 = arith.constant 0 : i32
    return %c0_i32, %c0_i32_0 : i32, i32
  }
  func.func @transform_5(%arg0: i32) -> (i32, i32) {
    %c0_i32 = arith.constant 0 : i32
    %c0_i32_0 = arith.constant 0 : i32
    %c0_i32_1 = arith.constant 0 : i32
    return %c0_i32, %c0_i32_0 : i32, i32
  }
  func.func @transform_6(%arg0: i32) -> (i32, i32) {
    %c0_i32 = arith.constant 0 : i32
    %c0_i32_0 = arith.constant 0 : i32
    %c0_i32_1 = arith.constant 0 : i32
    return %c0_i32, %c0_i32_0 : i32, i32
  }
  func.func @transform_7(%arg0: i32) -> (i32, i32) {
    %c0_i32 = arith.constant 0 : i32
    %c0_i32_0 = arith.constant 0 : i32
    %c0_i32_1 = arith.constant 0 : i32
    return %c0_i32, %c0_i32_0 : i32, i32
  }
  func.func @transform_8(%arg0: i32) -> (i32, i32) {
    %c0_i32 = arith.constant 0 : i32
    %c0_i32_0 = arith.constant 0 : i32
    %c0_i32_1 = arith.constant 0 : i32
    return %c0_i32, %c0_i32_0 : i32, i32
  }
  func.func @transform_9(%arg0: i32) -> (i32, i32) {
    %c0_i32 = arith.constant 0 : i32
    %c0_i32_0 = arith.constant 0 : i32
    return %c0_i32, %arg0 : i32, i32
  }
}

</mosaic_0001>

<bundles_post_ra>
// kernel: tpu_custom_call.1
= control target key start
LH: loop header
LB: loop body
LE: loop exit
PB: predicated region body
PF: predicated region fallthrough
CT: control target
= control target key end

     0   :  { %s557_s0 = inlined_call_operand.vmem [shape: f32[8,16], index: 0, kind: input, shape index: {}]   ;;  %s558_s1 = inlined_call_operand.vmem [shape: bf16[16,64], index: 1, kind: input, shape index: {}]   ;;  %s559_s2 = inlined_call_operand.vmem [shape: f32[1,64], index: 2, kind: input, shape index: {}]   ;;  %s560_s3 = inlined_call_operand.vmem [shape: bf16[64,40], index: 3, kind: input, shape index: {}]   ;;  %s561_s4 = inlined_call_operand.vmem [shape: f32[1,40], index: 4, kind: input, shape index: {}]   ;;  %s562_s5 = inlined_call_operand.vmem [shape: bf16[40,32], index: 5, kind: input, shape index: {}]   ;;  %s563_s6 = inlined_call_operand.vmem [shape: f32[1,32], index: 6, kind: input, shape index: {}]   ;;  %s564_s7 = inlined_call_operand.vmem [shape: bf16[1,32], index: 7, kind: input, shape index: {}]   ;;  %s565_s8 = inlined_call_operand.<no memory space> [shape: f32[1,1], index: 8, kind: input, shape index: {}]   ;;  %s566_s9 = inlined_call_operand.hbm [shape: f32[1,8], index: 9, kind: output, shape index: {}]  }
   0x1   :  { %v14_v0 = vstv %s565_s8 }
   0x2   :  { %15 = vst [vmem:[#allocation2] sm:$0x1] %v14_v0 }
   0x3   :  { %v409_v1 = vld [vmem:[%s558_s1] sm:$0xff]   ;;  %v445_v2 = vmov 0.0   ;;  %vm53_vm0 = vcmask 130048   ;;  %vm446_vm1 = vmmov 0   ;;  %v411_v6 = vld [vmem:[%s560_s3 + $0x8] sm:$0xff]  }
   0x4   :  { %370 = vmatprep.subr.bf16.mxu1 %v445_v2  ;;  %v36_v3 = vld [vmem:[%s557_s0] sm:$0xff]  ;;  %388 = vmatprep.subr.bf16.mxu0 %v445_v2 }
   0x5   :  { %v410_v4 = vld [vmem:[%s560_s3] sm:$0xff]   ;;  %371 = vmatpush3.bf16.msra.mxu1 %v409_v1  ;;  %372 = vmatprep.mubr.msk.bf16.mxu1 %vm446_vm1, %v445_v2  ;;  %v37_v5 = vpack.c.bf16 %v36_v3, %v36_v3 }
   0x6   :  { %376 = vmatprep.subr.bf16.mxu1 %v445_v2  ;;  %394 = vmatprep.mubr.msk.bf16.mxu0 %vm446_vm1, %v445_v2 }
   0x8   :  { %373 = vmatmul.mubr.msk.bf16.vlgmr.msra.gmra.mrb[0].mxu1 %vm53_vm0, %v37_v5 }
   0x9   :  { %377 = vmatpush3.bf16.msra.mxu1 %v410_v4  ;;  %384 = vmatprep.mubr.msk.bf16.mxu1 %vm446_vm1, %v445_v2 }
   0xa   :  { %16 = vsyncpa [#allocation4], 0  ;;  %378 = vmatprep.subr.bf16.mxu1 %v445_v2  ;;  %v412_v7 = vld [vmem:[%s560_s3 + $0x10] sm:$0xff]   ;;  %v413_v8 = vld [vmem:[%s560_s3 + $0x18] sm:$0xff]   ;;  %vm138_vm2 = vcmask 523264   ;;  %vm215_vm3 = vcmask 1043456   ;;  %v268_v41 = vlaneseq }
   0xb   :  { %v414_v9 = vld [vmem:[%s562_s5] sm:$0xff]   ;;  %v415_v18 = vld [vmem:[%s562_s5 + $0x8] sm:$0xff]   ;;  %v416_v19 = vld [vmem:[%s562_s5 + $0x10] ss:$0 sps:$4 sm:$0xff]   ;;  %vm211_vm4 = vcmask 326656   ;;  %v447_v30 = vmov 0  }
   0xc   :  { %389 = vmatpush3.bf16.msra.mxu0 %v414_v9  ;;  %v341_v10 = vld [vmem:[%s559_s2] ss:$0 sm:$0xff]  ;;  %v217_v20 = vsel %vm215_vm3, %v416_v19, 0  ;;  %408 = vset.pattern.permute.xlu0 %v447_v30  ;;  %vm272_vm5 = vcmask 261120   ;;  %v269_v42 = vshrl.u32 %v268_v41, 7  ;;  %vm325_vm6 = vcmask 57344  }
   0xd   :  { %379 = vmatpush3.bf16.msra.mxu1 %v411_v6  ;;  %390 = vmatprep.subr.bf16.mxu0 %v445_v2  ;;  %v344_v21 = vld [vmem:[%s561_s4] ss:$0 sm:$0xff] }
   0xe   :  { %380 = vmatprep.subr.bf16.mxu1 %v445_v2  ;;  %v262_v29 = vld [vmem:[#allocation2] sm:$0x1]  ;;  %v270_v43 = vsub.s32 0, %v269_v42 }
   0xf   :  { %265 = vperm.xlu0 %408, %v262_v29   ;;  %v350_v31 = vld [vmem:[%s563_s6] ss:$0 sm:$0xff]  ;;  %s448_s6 = smov [#allocation3]  }
  0x10   :  { %391 = vmatpush3.bf16.msra.mxu0 %v415_v18  ;;  %v260_v40 = vld [vmem:[%s564_s7] sm:$0x1]  ;;  %s333_s30 = sshll.u32 %s448_s6, 4  ;;  %s334_s30 = int_to_ptr.vmem [resolvable:$true] %s333_s30 }
  0x11   :  { %381 = vmatpush3.bf16.msra.mxu1 %v412_v7  ;;  %392 = vmatprep.subr.bf16.mxu0 %v445_v2  ;;  %s421_s7 = scalar_lea.vmem %s334_s30, 16  ;;  %s425_s10 = scalar_lea.vmem %s334_s30, 32 }
  0x12   :  { %382 = vmatprep.subr.bf16.mxu1 %v445_v2  ;;  %p422_p0 = scmp.ne.s32.totalorder %s334_s30, %s421_s7  ;;  %p426_p1 = scmp.lt.s32.totalorder %s334_s30, %s334_s30 }
  0x13   :  { %p427_p2 = scmp.lt.s32.totalorder %s425_s10, %s421_s7 }
  0x14   :  { %393 = vmatpush3.bf16.msra.mxu0 %v217_v20 }
  0x15   :  { %383 = vmatpush3.bf16.msra.mxu1 %v413_v8  ;;  %398 = vmatprep.subr.bf16.mxu0 %v445_v2  ;;  %p428_p3 = por %p427_p2, %p426_p1 }
  0x17   :  { %p429_p4 = pnand %p428_p3, %p422_p0 }
  0x8e   :  { %v266_v44 = vpop.permute.xlu0 %265 }
  0x8f   :  { %v271_v45 = vrot.slane %v266_v44, %v270_v43 }
  0xdb   :  { %v91_v11 = vpop.f32.mrb[0].mxu1 }
  0xdc   :  { %v92_v12 = vadd.f32 %v341_v10, %v91_v11  ;;  %v374_v13 = vpop.f32.mrb[1].mxu1 }
  0xdd   :  { %v94_v14 = vpop.f32.mrb[2].mxu1 }
  0xde   :  { %v97_v15 = vmax.f32 %v92_v12, 0.0  ;;  %v375_v16 = vpop.f32.mrb[3].mxu1 }
  0xe0   :  { %v98_v17 = vpack.c.bf16 %v97_v15, %v97_v15 }
  0xe2   :  { %385 = vmatmul.mubr.msk.bf16.vlgmr.msra.gmra.mrb[4].mxu1 %vm138_vm2, %v98_v17 }
 0x1b5   :  { %v176_v22 = vpop.f32.mrb[4].mxu1 }
 0x1b6   :  { %v177_v23 = vadd.f32 %v344_v21, %v176_v22  ;;  %v386_v24 = vpop.f32.mrb[5].mxu1 }
 0x1b7   :  { %v179_v25 = vpop.f32.mrb[6].mxu1 }
 0x1b8   :  { %v182_v26 = vmax.f32 %v177_v23, 0.0  ;;  %v387_v27 = vpop.f32.mrb[7].mxu1 }
 0x1ba   :  { %v183_v28 = vpack.c.bf16 %v182_v26, %v182_v26 }
 0x1bc   :  { %395 = vmatmul.mubr.msk.bf16.vlgmr.msra.gmra.mrb[0].mxu0 %vm211_vm4, %v183_v28 }
 0x1bd   :  { %400 = vmatprep.mubr.msk.bf16.mxu0 %vm446_vm1, %v445_v2 }
 0x28f   :  { %v253_v32 = vpop.f32.mrb[0].mxu0 }
 0x290   :  { %v254_v33 = vadd.f32 %v350_v31, %v253_v32  ;;  %v396_v34 = vpop.f32.mrb[1].mxu0 }
 0x291   :  { %v256_v35 = vpop.f32.mrb[2].mxu0 }
 0x292   :  { %v259_v36 = vmax.f32 %v254_v33, 0.0  ;;  %v397_v37 = vpop.f32.mrb[3].mxu0 }
 0x294   :  { %v261_v38 = vpack.c.bf16 %v259_v36, %v259_v36 }
 0x296   :  { %v277_v39 = vsel %vm272_vm5, %v261_v38, 0 }
 0x297   :  { %399 = vmatpush3.bf16.xpose.msra.mxu0 %v277_v39 }
 0x29e   :  { %401 = vmatmul.mubr.msk.bf16.vlgmr.msra.gmra.mrb[4].mxu0 %vm272_vm5, %v260_v40 }
 0x371   :  { %v313_v46 = vpop.f32.mrb[4].mxu0 }
 0x372   :  { %v314_v47 = vadd.f32 %v313_v46, %v271_v45  ;;  %v402_v48 = vpop.f32.mrb[5].mxu0 }
 0x373   :  { %v316_v49 = vpop.f32.mrb[6].mxu0 }
 0x374   :  { %v356_v50 = vmul.f32 -1.442695, %v314_v47  ;;  %v403_v51 = vpop.f32.mrb[7].mxu0 }
 0x376   :  { %417 = vpow2.f32 %v356_v50 }
 0x380   :  { %v418_v52 = vpop.eup %417 }
 0x381   :  { %v322_v53 = vadd.f32 1.0, %v418_v52 }
 0x383   :  { %419 = vrcp.f32 %v322_v53 }
 0x38d   :  { %v420_v54 = vpop.eup %419 }
 0x38e   :  { %326 = vst.msk [vmem:[#allocation3] sm:$0x1] %vm325_vm6, %v420_v54 }
 0x38f   :  { %432 = shalt.err (!%p429_p4)
}
 0x390   :  { %s433_s13 = scalar_lea.hbm %s566_s9, 16 }
 0x391   :  { %p434_p5 = scmp.ne.s32.totalorder %s566_s9, %s433_s13  ;;  %p437_p6 = scmp.lt.u32.totalorder %s433_s13, %s566_s9 }
 0x393   :  { %p439_p7 = pnand %p437_p6, %p434_p5 }
 0x395   :  { %442 = shalt.err (!%p439_p7)
}
 0x396   :  { %336 = dma.vmem_to_hbm [thread:$0]  %s334_s30, 16, %s566_s9, [#allocation4]  }
 0x397   :  { %443 = dma.done.wait [#allocation4], 16  }
 0x398   :  { %444 = vsyncadd [#allocation4], 4294967280 }
 0x399   :  { %340 = vsyncpa [#allocation4], 1 }

</bundles_post_ra>
